<compile_context>
chip_gen: v7x
topology: tpu7x:2x2x1
jax: 0.10.0
libtpu: 0.0.40
codegen_flags: <defaults>
</compile_context>

<pallas_src>
import functools
import math

import numpy as np

import jax
import jax.numpy as jnp
from jax.experimental import pallas as pl
from jax.experimental.pallas import tpu as pltpu


def _residual_block_kernel(x_ref, w1_ref, w2_ref, wsc_ref,
                           r_ref, rt_ref, mdn_ref, mup_ref,
                           gb1_ref, gb2_ref, gbs_ref,
                           o_ref, *, w_size):
    """Whole residual block in one invocation, lane-dense (N*H, W*C) layout.

    x_ref   : (N*H, W*Cin_pad)      bf16 input activation slab
    w1_ref  : (W*Cin_pad, 3*W*Cout) bf16 conv1 banded weights (3 ky bands on lanes)
    w2_ref  : (W*Cout,    3*W*Cout) bf16 conv2 banded weights
    wsc_ref : (W*Cin_pad, W*Cout)   bf16 1x1 projection shortcut (block-diagonal)
    r_ref   : (W*Cout, Cout)        f32 per-channel gather matrix
    rt_ref  : (Cout, W*Cout)        f32 per-channel scatter matrix
    mdn/mup : (N*H, W*Cout)         f32 masks zeroing first/last row of each image
    gb*_ref : (2, Cout)             f32 stacked BN (gamma, beta)
    o_ref   : (N*H, W*Cout)         f32 output slab
    """
    NH = x_ref.shape[0]
    WC = o_ref.shape[1]                 # W * Cout, a multiple of 128
    Cout = r_ref.shape[1]
    eps = 1e-5
    inv_cnt = 1.0 / (NH * w_size)       # 1 / (N*H*W)

    r_mat = r_ref[...]
    rt_mat = rt_ref[...]
    mask_dn = mdn_ref[...]
    mask_up = mup_ref[...]

    sub2_wc = jax.lax.broadcasted_iota(jnp.int32, (2, WC), 0)
    sub2_c = jax.lax.broadcasted_iota(jnp.int32, (2, Cout), 0)

    def conv3x3(src, w_ref):
        # Band-by-band: three (NH, K) x (K, WC) bf16 matmuls (128-aligned lane
        # slices of the banded weights), so only one (NH, WC) f32 band is live.
        acc = jnp.dot(src, w_ref[:, WC:2 * WC],
                      preferred_element_type=jnp.float32)          # ky = 1
        z0 = jnp.dot(src, w_ref[:, 0:WC],
                     preferred_element_type=jnp.float32)           # ky = 0
        acc = acc + pltpu.roll(z0, 1, 0) * mask_dn                 # row h-1
        z2 = jnp.dot(src, w_ref[:, 2 * WC:3 * WC],
                     preferred_element_type=jnp.float32)           # ky = 2
        acc = acc + pltpu.roll(z2, NH - 1, 0) * mask_up            # row h+1
        return acc

    def batch_norm(y, gb_ref):
        # training-mode BN (biased stats over N,H,W) folded into one FMA.
        s1 = jnp.sum(y, axis=0, keepdims=True)                     # (1, WC)
        s2 = jnp.sum(y * y, axis=0, keepdims=True)                 # (1, WC)
        s12 = jnp.where(sub2_wc == 0, s1, s2)                      # (2, WC)
        stats = jnp.dot(s12, r_mat,
                        preferred_element_type=jnp.float32) * inv_cnt  # (2, Cout)
        mean = stats[0:1, :]
        var = stats[1:2, :] - mean * mean
        gb = gb_ref[...]
        scale = gb[0:1, :] * jax.lax.rsqrt(var + eps)              # (1, Cout)
        bias = gb[1:2, :] - mean * scale                           # (1, Cout)
        sb = jnp.where(sub2_c == 0, scale, bias)                   # (2, Cout)
        sb_l = jnp.dot(sb, rt_mat,
                       preferred_element_type=jnp.float32)         # (2, WC)
        return y * sb_l[0:1, :] + sb_l[1:2, :]

    x = x_ref[...]                                                 # bf16

    # conv1 -> bn1 -> relu
    h = jnp.maximum(batch_norm(conv3x3(x, w1_ref), gb1_ref), 0.0)
    # conv2 -> bn2   (cast intermediate to bf16 for the MXU)
    h = batch_norm(conv3x3(h.astype(jnp.bfloat16), w2_ref), gb2_ref)
    # projection shortcut: 1x1 conv + bn
    sc = batch_norm(jnp.dot(x, wsc_ref[...],
                            preferred_element_type=jnp.float32), gbs_ref)
    # residual add + final relu (lane-dense, unmasked stores)
    o_ref[...] = jnp.maximum(h + sc, 0.0)


def _banded_conv3x3_weights(w_hwio, width):
    """(3,3,Cin,Cout) HWIO -> (width*Cin, 3*width*Cout) banded weight matrix.

    For tap row ky:  big[ky][(w+kx-1)*Cin + ci, w*Cout + co] = w[ky, kx, ci, co],
    terms with w+kx-1 outside [0, width) dropped (== zero 'SAME' width padding).
    The three ky bands are concatenated along the lane (output) axis.
    """
    w_hwio = w_hwio.astype(jnp.float32)
    cin, cout = w_hwio.shape[2], w_hwio.shape[3]
    mats = []
    for ky in range(3):
        m = jnp.zeros((width * cin, width * cout), jnp.float32)
        for kx in range(3):
            m = m + jnp.kron(jnp.eye(width, k=1 - kx, dtype=jnp.float32),
                             w_hwio[ky, kx])
        mats.append(m)
    return jnp.concatenate(mats, axis=1)


def residual_block(x_nchw, params):
    # TODO(synk): only stride=1 with the projection shortcut (in_ch != out_ch)
    # is implemented; identity-shortcut / stride=2 variants are not.
    (w1, g1, b1, w2, g2, b2, ws, gs, bs) = params
    N, Cin, H, W = x_nchw.shape
    Cout = w1.shape[-1]
    NH, WC = N * H, W * Cout
    # TODO(synk): pad Cout (and mask the padded BN channels) when W*Cout is not
    # already a 128 multiple; the demo shape satisfies it.
    assert WC % 128 == 0, "W*Cout must be a multiple of 128"

    # Pad input channels so the input slab is also a full 128-lane multiple.
    lane_mult = 128 // math.gcd(128, W)
    Cin_p = ((Cin + lane_mult - 1) // lane_mult) * lane_mult
    WCin = W * Cin_p

    # NCHW -> lane-dense (N*H, W*Cin_pad) bf16 activation slab.
    # TODO(synk): accept NHWC inputs directly to drop this relayout at scale.
    xs = jnp.transpose(x_nchw, (0, 2, 3, 1)).astype(jnp.float32)
    xs = jnp.pad(xs, ((0, 0), (0, 0), (0, 0), (0, Cin_p - Cin)))
    xslab = xs.reshape(NH, WCin).astype(jnp.bfloat16)

    # Banded weights (built once, bf16 MXU operands).
    w1p = jnp.pad(w1.astype(jnp.float32),
                  ((0, 0), (0, 0), (0, Cin_p - Cin), (0, 0)))
    w1b = _banded_conv3x3_weights(w1p, W).astype(jnp.bfloat16)       # (WCin, 3*WC)
    w2b = _banded_conv3x3_weights(w2.astype(jnp.float32),
                                  W).astype(jnp.bfloat16)            # (WC, 3*WC)
    wsp = jnp.pad(ws.astype(jnp.float32), ((0, Cin_p - Cin), (0, 0)))
    wscb = jnp.kron(jnp.eye(W, dtype=jnp.float32),
                    wsp).astype(jnp.bfloat16)                        # (WCin, WC)

    # Constant per-channel gather/scatter matrices and row-boundary masks,
    # hoisted out of the kernel (lane l of the slab holds channel l % Cout).
    lane = np.arange(WC)[:, None]
    chan = np.arange(Cout)[None, :]
    r_np = (lane % Cout == chan).astype(np.float32)                  # (WC, Cout)
    r_mat = jnp.asarray(r_np)
    rt_mat = jnp.asarray(np.ascontiguousarray(r_np.T))               # (Cout, WC)
    row = np.arange(NH)[:, None]
    mask_dn = jnp.asarray(
        np.broadcast_to(row % H != 0, (NH, WC)).astype(np.float32))
    mask_up = jnp.asarray(
        np.broadcast_to(row % H != H - 1, (NH, WC)).astype(np.float32))

    def gb(g, b):
        return jnp.stack([g.reshape(Cout), b.reshape(Cout)]).astype(jnp.float32)

    kernel = functools.partial(_residual_block_kernel, w_size=W)
    out_slab = pl.pallas_call(
        kernel,
        out_shape=jax.ShapeDtypeStruct((NH, WC), jnp.float32),
        in_specs=[pl.BlockSpec(memory_space=pltpu.MemorySpace.VMEM)] * 11,
        out_specs=pl.BlockSpec(memory_space=pltpu.MemorySpace.VMEM),
    )(xslab, w1b, w2b, wscb, r_mat, rt_mat, mask_dn, mask_up,
      gb(g1, b1), gb(g2, b2), gb(gs, bs))

    out = out_slab.reshape(N, H, W, Cout)
    return jnp.transpose(out, (0, 3, 1, 2))                          # -> NCHW


def residual_block_ref(x_nchw, params):
    """Pure-JAX reference (same math, XLA convs) for correctness checking."""
    (w1, g1, b1, w2, g2, b2, ws, gs, bs) = params
    x = jnp.transpose(x_nchw, (0, 2, 3, 1))

    def conv(y, w):
        return jax.lax.conv_general_dilated(
            y, w, window_strides=(1, 1), padding="SAME",
            dimension_numbers=("NHWC", "HWIO", "NHWC"))

    def bn(y, g, b):
        m = y.mean(axis=(0, 1, 2), keepdims=True)
        v = ((y - m) ** 2).mean(axis=(0, 1, 2), keepdims=True)
        return (y - m) / jnp.sqrt(v + 1e-5) * g + b

    h = jax.nn.relu(bn(conv(x, w1), g1, b1))
    h = bn(conv(h, w2), g2, b2)
    sc = bn(jnp.einsum("nhwc,cd->nhwd", x, ws), gs, bs)
    out = jax.nn.relu(h + sc)
    return jnp.transpose(out, (0, 3, 1, 2))


if __name__ == "__main__":
    # ResidualBlock(in_channels=4, out_channels=8, stride=1) -> projection shortcut
    N, Cin, Cout, H, W = 2, 4, 8, 16, 16
    keys = jax.random.split(jax.random.PRNGKey(0), 10)

    w1 = 0.3 * jax.random.normal(keys[0], (3, 3, Cin, Cout), jnp.float32)   # conv1 (HWIO)
    g1 = 1.0 + 0.1 * jax.random.normal(keys[1], (Cout,), jnp.float32)
    b1 = 0.1 * jax.random.normal(keys[2], (Cout,), jnp.float32)
    w2 = 0.3 * jax.random.normal(keys[3], (3, 3, Cout, Cout), jnp.float32)  # conv2 (HWIO)
    g2 = 1.0 + 0.1 * jax.random.normal(keys[4], (Cout,), jnp.float32)
    b2 = 0.1 * jax.random.normal(keys[5], (Cout,), jnp.float32)
    ws = 0.3 * jax.random.normal(keys[6], (Cin, Cout), jnp.float32)         # 1x1 shortcut conv
    gs = 1.0 + 0.1 * jax.random.normal(keys[7], (Cout,), jnp.float32)
    bs = 0.1 * jax.random.normal(keys[8], (Cout,), jnp.float32)
    params = (w1, g1, b1, w2, g2, b2, ws, gs, bs)

    x = jax.random.normal(keys[9], (N, Cin, H, W), jnp.float32)             # NCHW like PyTorch

    out = jax.block_until_ready(residual_block(x, params))
    ref = jax.block_until_ready(residual_block_ref(x, params))

    assert out.shape == (N, Cout, H, W)
    assert bool(jnp.allclose(out, ref, atol=5e-2, rtol=5e-2)), \
        float(jnp.max(jnp.abs(out - ref)))
    print("KERNEL_OK")
</pallas_src>

<mosaic_0001>
module attributes {stable_mosaic.version = 11 : i64} {
  func.func @_residual_block_kernel(%arg0: memref<32x128xbf16, #tpu.memory_space<vmem>>, %arg1: memref<128x384xbf16, #tpu.memory_space<vmem>>, %arg2: memref<128x384xbf16, #tpu.memory_space<vmem>>, %arg3: memref<128x128xbf16, #tpu.memory_space<vmem>>, %arg4: memref<128x8xf32, #tpu.memory_space<vmem>>, %arg5: memref<8x128xf32, #tpu.memory_space<vmem>>, %arg6: memref<32x128xf32, #tpu.memory_space<vmem>>, %arg7: memref<32x128xf32, #tpu.memory_space<vmem>>, %arg8: memref<2x8xf32, #tpu.memory_space<vmem>>, %arg9: memref<2x8xf32, #tpu.memory_space<vmem>>, %arg10: memref<2x8xf32, #tpu.memory_space<vmem>>, %arg11: memref<32x128xf32, #tpu.memory_space<vmem>>) attributes {dimension_semantics = [], scalar_prefetch = 0 : i64, scratch_operands = 0 : i64, tpu.core_type = #tpu.core_type<tc>} {
    %c0 = arith.constant 0 : index
    %c0_0 = arith.constant 0 : index
    %0 = vector.load %arg4[%c0, %c0_0] : memref<128x8xf32, #tpu.memory_space<vmem>>, vector<128x8xf32>
    %c0_1 = arith.constant 0 : index
    %c0_2 = arith.constant 0 : index
    %1 = vector.load %arg5[%c0_1, %c0_2] : memref<8x128xf32, #tpu.memory_space<vmem>>, vector<8x128xf32>
    %c0_3 = arith.constant 0 : index
    %c0_4 = arith.constant 0 : index
    %2 = vector.load %arg6[%c0_3, %c0_4] : memref<32x128xf32, #tpu.memory_space<vmem>>, vector<32x128xf32>
    %c0_5 = arith.constant 0 : index
    %c0_6 = arith.constant 0 : index
    %3 = vector.load %arg7[%c0_5, %c0_6] : memref<32x128xf32, #tpu.memory_space<vmem>>, vector<32x128xf32>
    %4 = tpu.iota {dimensions = array<i32: 0>} : vector<2x128xi32>
    %5 = tpu.iota {dimensions = array<i32: 0>} : vector<2x8xi32>
    %c0_7 = arith.constant 0 : index
    %c0_8 = arith.constant 0 : index
    %6 = vector.load %arg0[%c0_7, %c0_8] : memref<32x128xbf16, #tpu.memory_space<vmem>>, vector<32x128xbf16>
    %c0_9 = arith.constant 0 : index
    %c128 = arith.constant 128 : index
    %7 = vector.load %arg1[%c0_9, %c128] : memref<128x384xbf16, #tpu.memory_space<vmem>>, vector<128x128xbf16>
    %cst = arith.constant dense<0.000000e+00> : vector<32x128xf32>
    %8 = tpu.matmul %6, %7, %cst {dimension_numbers = #tpu.dot_dimension_numbers<[1], [0], [0], [1], [0, 0, 1, 1], [], []>} : vector<32x128xbf16>, vector<128x128xbf16>, vector<32x128xf32> -> vector<32x128xf32>
    %c0_10 = arith.constant 0 : index
    %c0_11 = arith.constant 0 : index
    %9 = vector.load %arg1[%c0_10, %c0_11] : memref<128x384xbf16, #tpu.memory_space<vmem>>, vector<128x128xbf16>
    %cst_12 = arith.constant dense<0.000000e+00> : vector<32x128xf32>
    %10 = tpu.matmul %6, %9, %cst_12 {dimension_numbers = #tpu.dot_dimension_numbers<[1], [0], [0], [1], [0, 0, 1, 1], [], []>} : vector<32x128xbf16>, vector<128x128xbf16>, vector<32x128xf32> -> vector<32x128xf32>
    %c1_i32 = arith.constant 1 : i32
    %11 = tpu.dynamic_rotate %10 by %c1_i32 dim 0 : vector<32x128xf32>, i32 -> vector<32x128xf32>
    %12 = arith.mulf %11, %2 : vector<32x128xf32>
    %13 = arith.addf %8, %12 : vector<32x128xf32>
    %c0_13 = arith.constant 0 : index
    %c256 = arith.constant 256 : index
    %14 = vector.load %arg1[%c0_13, %c256] : memref<128x384xbf16, #tpu.memory_space<vmem>>, vector<128x128xbf16>
    %cst_14 = arith.constant dense<0.000000e+00> : vector<32x128xf32>
    %15 = tpu.matmul %6, %14, %cst_14 {dimension_numbers = #tpu.dot_dimension_numbers<[1], [0], [0], [1], [0, 0, 1, 1], [], []>} : vector<32x128xbf16>, vector<128x128xbf16>, vector<32x128xf32> -> vector<32x128xf32>
    %c31_i32 = arith.constant 31 : i32
    %16 = tpu.dynamic_rotate %15 by %c31_i32 dim 0 : vector<32x128xf32>, i32 -> vector<32x128xf32>
    %17 = arith.mulf %16, %3 : vector<32x128xf32>
    %18 = arith.addf %13, %17 : vector<32x128xf32>
    %cst_15 = arith.constant dense<0.000000e+00> : vector<128xf32>
    %19 = vector.multi_reduction <add>, %18, %cst_15 [0] : vector<32x128xf32> to vector<128xf32>
    %20 = vector.shape_cast %19 : vector<128xf32> to vector<1x128xf32>
    %21 = arith.mulf %18, %18 : vector<32x128xf32>
    %cst_16 = arith.constant dense<0.000000e+00> : vector<128xf32>
    %22 = vector.multi_reduction <add>, %21, %cst_16 [0] : vector<32x128xf32> to vector<128xf32>
    %23 = vector.shape_cast %22 : vector<128xf32> to vector<1x128xf32>
    %c0_i32 = arith.constant 0 : i32
    %24 = vector.broadcast %c0_i32 : i32 to vector<2x128xi32>
    %25 = arith.cmpi eq, %4, %24 : vector<2x128xi32>
    %26 = vector.shape_cast %20 : vector<1x128xf32> to vector<1x128xf32>
    %27 = vector.broadcast %26 : vector<1x128xf32> to vector<2x128xf32>
    %28 = vector.shape_cast %23 : vector<1x128xf32> to vector<1x128xf32>
    %29 = vector.broadcast %28 : vector<1x128xf32> to vector<2x128xf32>
    %30 = arith.select %25, %27, %29 : vector<2x128xi1>, vector<2x128xf32>
    %cst_17 = arith.constant dense<0.000000e+00> : vector<2x8xf32>
    %31 = tpu.matmul %30, %0, %cst_17 {dimension_numbers = #tpu.dot_dimension_numbers<[1], [0], [0], [1], [0, 0, 1, 1], [], []>} : vector<2x128xf32>, vector<128x8xf32>, vector<2x8xf32> -> vector<2x8xf32>
    %cst_18 = arith.constant 0.001953125 : f32
    %32 = vector.broadcast %cst_18 : f32 to vector<2x8xf32>
    %33 = arith.mulf %31, %32 : vector<2x8xf32>
    %34 = vector.extract_strided_slice %33 {offsets = [0, 0], sizes = [1, 8], strides = [1, 1]} : vector<2x8xf32> to vector<1x8xf32>
    %35 = vector.extract_strided_slice %33 {offsets = [1, 0], sizes = [1, 8], strides = [1, 1]} : vector<2x8xf32> to vector<1x8xf32>
    %36 = arith.mulf %34, %34 : vector<1x8xf32>
    %37 = arith.subf %35, %36 : vector<1x8xf32>
    %c0_19 = arith.constant 0 : index
    %c0_20 = arith.constant 0 : index
    %38 = vector.load %arg8[%c0_19, %c0_20] : memref<2x8xf32, #tpu.memory_space<vmem>>, vector<2x8xf32>
    %39 = vector.extract_strided_slice %38 {offsets = [0, 0], sizes = [1, 8], strides = [1, 1]} : vector<2x8xf32> to vector<1x8xf32>
    %cst_21 = arith.constant 9.99999974E-6 : f32
    %40 = vector.broadcast %cst_21 : f32 to vector<1x8xf32>
    %41 = arith.addf %37, %40 : vector<1x8xf32>
    %42 = math.rsqrt %41 : vector<1x8xf32>
    %43 = arith.mulf %39, %42 : vector<1x8xf32>
    %44 = vector.extract_strided_slice %38 {offsets = [1, 0], sizes = [1, 8], strides = [1, 1]} : vector<2x8xf32> to vector<1x8xf32>
    %45 = arith.mulf %34, %43 : vector<1x8xf32>
    %46 = arith.subf %44, %45 : vector<1x8xf32>
    %c0_i32_22 = arith.constant 0 : i32
    %47 = vector.broadcast %c0_i32_22 : i32 to vector<2x8xi32>
    %48 = arith.cmpi eq, %5, %47 : vector<2x8xi32>
    %49 = vector.shape_cast %43 : vector<1x8xf32> to vector<1x8xf32>
    %50 = vector.broadcast %49 : vector<1x8xf32> to vector<2x8xf32>
    %51 = vector.shape_cast %46 : vector<1x8xf32> to vector<1x8xf32>
    %52 = vector.broadcast %51 : vector<1x8xf32> to vector<2x8xf32>
    %53 = arith.select %48, %50, %52 : vector<2x8xi1>, vector<2x8xf32>
    %cst_23 = arith.constant dense<0.000000e+00> : vector<2x128xf32>
    %54 = tpu.matmul %53, %1, %cst_23 {dimension_numbers = #tpu.dot_dimension_numbers<[1], [0], [0], [1], [0, 0, 1, 1], [], []>} : vector<2x8xf32>, vector<8x128xf32>, vector<2x128xf32> -> vector<2x128xf32>
    %55 = vector.extract_strided_slice %54 {offsets = [0, 0], sizes = [1, 128], strides = [1, 1]} : vector<2x128xf32> to vector<1x128xf32>
    %56 = vector.broadcast %55 : vector<1x128xf32> to vector<32x128xf32>
    %57 = arith.mulf %18, %56 : vector<32x128xf32>
    %58 = vector.extract_strided_slice %54 {offsets = [1, 0], sizes = [1, 128], strides = [1, 1]} : vector<2x128xf32> to vector<1x128xf32>
    %59 = vector.broadcast %58 : vector<1x128xf32> to vector<32x128xf32>
    %60 = arith.addf %57, %59 : vector<32x128xf32>
    %cst_24 = arith.constant 0.000000e+00 : f32
    %61 = vector.broadcast %cst_24 : f32 to vector<32x128xf32>
    %62 = arith.maximumf %60, %61 : vector<32x128xf32>
    %63 = arith.truncf %62 : vector<32x128xf32> to vector<32x128xbf16>
    %c0_25 = arith.constant 0 : index
    %c128_26 = arith.constant 128 : index
    %64 = vector.load %arg2[%c0_25, %c128_26] : memref<128x384xbf16, #tpu.memory_space<vmem>>, vector<128x128xbf16>
    %cst_27 = arith.constant dense<0.000000e+00> : vector<32x128xf32>
    %65 = tpu.matmul %63, %64, %cst_27 {dimension_numbers = #tpu.dot_dimension_numbers<[1], [0], [0], [1], [0, 0, 1, 1], [], []>} : vector<32x128xbf16>, vector<128x128xbf16>, vector<32x128xf32> -> vector<32x128xf32>
    %c0_28 = arith.constant 0 : index
    %c0_29 = arith.constant 0 : index
    %66 = vector.load %arg2[%c0_28, %c0_29] : memref<128x384xbf16, #tpu.memory_space<vmem>>, vector<128x128xbf16>
    %cst_30 = arith.constant dense<0.000000e+00> : vector<32x128xf32>
    %67 = tpu.matmul %63, %66, %cst_30 {dimension_numbers = #tpu.dot_dimension_numbers<[1], [0], [0], [1], [0, 0, 1, 1], [], []>} : vector<32x128xbf16>, vector<128x128xbf16>, vector<32x128xf32> -> vector<32x128xf32>
    %c1_i32_31 = arith.constant 1 : i32
    %68 = tpu.dynamic_rotate %67 by %c1_i32_31 dim 0 : vector<32x128xf32>, i32 -> vector<32x128xf32>
    %69 = arith.mulf %68, %2 : vector<32x128xf32>
    %70 = arith.addf %65, %69 : vector<32x128xf32>
    %c0_32 = arith.constant 0 : index
    %c256_33 = arith.constant 256 : index
    %71 = vector.load %arg2[%c0_32, %c256_33] : memref<128x384xbf16, #tpu.memory_space<vmem>>, vector<128x128xbf16>
    %cst_34 = arith.constant dense<0.000000e+00> : vector<32x128xf32>
    %72 = tpu.matmul %63, %71, %cst_34 {dimension_numbers = #tpu.dot_dimension_numbers<[1], [0], [0], [1], [0, 0, 1, 1], [], []>} : vector<32x128xbf16>, vector<128x128xbf16>, vector<32x128xf32> -> vector<32x128xf32>
    %c31_i32_35 = arith.constant 31 : i32
    %73 = tpu.dynamic_rotate %72 by %c31_i32_35 dim 0 : vector<32x128xf32>, i32 -> vector<32x128xf32>
    %74 = arith.mulf %73, %3 : vector<32x128xf32>
    %75 = arith.addf %70, %74 : vector<32x128xf32>
    %cst_36 = arith.constant dense<0.000000e+00> : vector<128xf32>
    %76 = vector.multi_reduction <add>, %75, %cst_36 [0] : vector<32x128xf32> to vector<128xf32>
    %77 = vector.shape_cast %76 : vector<128xf32> to vector<1x128xf32>
    %78 = arith.mulf %75, %75 : vector<32x128xf32>
    %cst_37 = arith.constant dense<0.000000e+00> : vector<128xf32>
    %79 = vector.multi_reduction <add>, %78, %cst_37 [0] : vector<32x128xf32> to vector<128xf32>
    %80 = vector.shape_cast %79 : vector<128xf32> to vector<1x128xf32>
    %c0_i32_38 = arith.constant 0 : i32
    %81 = vector.broadcast %c0_i32_38 : i32 to vector<2x128xi32>
    %82 = arith.cmpi eq, %4, %81 : vector<2x128xi32>
    %83 = vector.shape_cast %77 : vector<1x128xf32> to vector<1x128xf32>
    %84 = vector.broadcast %83 : vector<1x128xf32> to vector<2x128xf32>
    %85 = vector.shape_cast %80 : vector<1x128xf32> to vector<1x128xf32>
    %86 = vector.broadcast %85 : vector<1x128xf32> to vector<2x128xf32>
    %87 = arith.select %82, %84, %86 : vector<2x128xi1>, vector<2x128xf32>
    %cst_39 = arith.constant dense<0.000000e+00> : vector<2x8xf32>
    %88 = tpu.matmul %87, %0, %cst_39 {dimension_numbers = #tpu.dot_dimension_numbers<[1], [0], [0], [1], [0, 0, 1, 1], [], []>} : vector<2x128xf32>, vector<128x8xf32>, vector<2x8xf32> -> vector<2x8xf32>
    %cst_40 = arith.constant 0.001953125 : f32
    %89 = vector.broadcast %cst_40 : f32 to vector<2x8xf32>
    %90 = arith.mulf %88, %89 : vector<2x8xf32>
    %91 = vector.extract_strided_slice %90 {offsets = [0, 0], sizes = [1, 8], strides = [1, 1]} : vector<2x8xf32> to vector<1x8xf32>
    %92 = vector.extract_strided_slice %90 {offsets = [1, 0], sizes = [1, 8], strides = [1, 1]} : vector<2x8xf32> to vector<1x8xf32>
    %93 = arith.mulf %91, %91 : vector<1x8xf32>
    %94 = arith.subf %92, %93 : vector<1x8xf32>
    %c0_41 = arith.constant 0 : index
    %c0_42 = arith.constant 0 : index
    %95 = vector.load %arg9[%c0_41, %c0_42] : memref<2x8xf32, #tpu.memory_space<vmem>>, vector<2x8xf32>
    %96 = vector.extract_strided_slice %95 {offsets = [0, 0], sizes = [1, 8], strides = [1, 1]} : vector<2x8xf32> to vector<1x8xf32>
    %cst_43 = arith.constant 9.99999974E-6 : f32
    %97 = vector.broadcast %cst_43 : f32 to vector<1x8xf32>
    %98 = arith.addf %94, %97 : vector<1x8xf32>
    %99 = math.rsqrt %98 : vector<1x8xf32>
    %100 = arith.mulf %96, %99 : vector<1x8xf32>
    %101 = vector.extract_strided_slice %95 {offsets = [1, 0], sizes = [1, 8], strides = [1, 1]} : vector<2x8xf32> to vector<1x8xf32>
    %102 = arith.mulf %91, %100 : vector<1x8xf32>
    %103 = arith.subf %101, %102 : vector<1x8xf32>
    %c0_i32_44 = arith.constant 0 : i32
    %104 = vector.broadcast %c0_i32_44 : i32 to vector<2x8xi32>
    %105 = arith.cmpi eq, %5, %104 : vector<2x8xi32>
    %106 = vector.shape_cast %100 : vector<1x8xf32> to vector<1x8xf32>
    %107 = vector.broadcast %106 : vector<1x8xf32> to vector<2x8xf32>
    %108 = vector.shape_cast %103 : vector<1x8xf32> to vector<1x8xf32>
    %109 = vector.broadcast %108 : vector<1x8xf32> to vector<2x8xf32>
    %110 = arith.select %105, %107, %109 : vector<2x8xi1>, vector<2x8xf32>
    %cst_45 = arith.constant dense<0.000000e+00> : vector<2x128xf32>
    %111 = tpu.matmul %110, %1, %cst_45 {dimension_numbers = #tpu.dot_dimension_numbers<[1], [0], [0], [1], [0, 0, 1, 1], [], []>} : vector<2x8xf32>, vector<8x128xf32>, vector<2x128xf32> -> vector<2x128xf32>
    %112 = vector.extract_strided_slice %111 {offsets = [0, 0], sizes = [1, 128], strides = [1, 1]} : vector<2x128xf32> to vector<1x128xf32>
    %113 = vector.broadcast %112 : vector<1x128xf32> to vector<32x128xf32>
    %114 = arith.mulf %75, %113 : vector<32x128xf32>
    %115 = vector.extract_strided_slice %111 {offsets = [1, 0], sizes = [1, 128], strides = [1, 1]} : vector<2x128xf32> to vector<1x128xf32>
    %116 = vector.broadcast %115 : vector<1x128xf32> to vector<32x128xf32>
    %117 = arith.addf %114, %116 : vector<32x128xf32>
    %c0_46 = arith.constant 0 : index
    %c0_47 = arith.constant 0 : index
    %118 = vector.load %arg3[%c0_46, %c0_47] : memref<128x128xbf16, #tpu.memory_space<vmem>>, vector<128x128xbf16>
    %cst_48 = arith.constant dense<0.000000e+00> : vector<32x128xf32>
    %119 = tpu.matmul %6, %118, %cst_48 {dimension_numbers = #tpu.dot_dimension_numbers<[1], [0], [0], [1], [0, 0, 1, 1], [], []>} : vector<32x128xbf16>, vector<128x128xbf16>, vector<32x128xf32> -> vector<32x128xf32>
    %cst_49 = arith.constant dense<0.000000e+00> : vector<128xf32>
    %120 = vector.multi_reduction <add>, %119, %cst_49 [0] : vector<32x128xf32> to vector<128xf32>
    %121 = vector.shape_cast %120 : vector<128xf32> to vector<1x128xf32>
    %122 = arith.mulf %119, %119 : vector<32x128xf32>
    %cst_50 = arith.constant dense<0.000000e+00> : vector<128xf32>
    %123 = vector.multi_reduction <add>, %122, %cst_50 [0] : vector<32x128xf32> to vector<128xf32>
    %124 = vector.shape_cast %123 : vector<128xf32> to vector<1x128xf32>
    %c0_i32_51 = arith.constant 0 : i32
    %125 = vector.broadcast %c0_i32_51 : i32 to vector<2x128xi32>
    %126 = arith.cmpi eq, %4, %125 : vector<2x128xi32>
    %127 = vector.shape_cast %121 : vector<1x128xf32> to vector<1x128xf32>
    %128 = vector.broadcast %127 : vector<1x128xf32> to vector<2x128xf32>
    %129 = vector.shape_cast %124 : vector<1x128xf32> to vector<1x128xf32>
    %130 = vector.broadcast %129 : vector<1x128xf32> to vector<2x128xf32>
    %131 = arith.select %126, %128, %130 : vector<2x128xi1>, vector<2x128xf32>
    %cst_52 = arith.constant dense<0.000000e+00> : vector<2x8xf32>
    %132 = tpu.matmul %131, %0, %cst_52 {dimension_numbers = #tpu.dot_dimension_numbers<[1], [0], [0], [1], [0, 0, 1, 1], [], []>} : vector<2x128xf32>, vector<128x8xf32>, vector<2x8xf32> -> vector<2x8xf32>
    %cst_53 = arith.constant 0.001953125 : f32
    %133 = vector.broadcast %cst_53 : f32 to vector<2x8xf32>
    %134 = arith.mulf %132, %133 : vector<2x8xf32>
    %135 = vector.extract_strided_slice %134 {offsets = [0, 0], sizes = [1, 8], strides = [1, 1]} : vector<2x8xf32> to vector<1x8xf32>
    %136 = vector.extract_strided_slice %134 {offsets = [1, 0], sizes = [1, 8], strides = [1, 1]} : vector<2x8xf32> to vector<1x8xf32>
    %137 = arith.mulf %135, %135 : vector<1x8xf32>
    %138 = arith.subf %136, %137 : vector<1x8xf32>
    %c0_54 = arith.constant 0 : index
    %c0_55 = arith.constant 0 : index
    %139 = vector.load %arg10[%c0_54, %c0_55] : memref<2x8xf32, #tpu.memory_space<vmem>>, vector<2x8xf32>
    %140 = vector.extract_strided_slice %139 {offsets = [0, 0], sizes = [1, 8], strides = [1, 1]} : vector<2x8xf32> to vector<1x8xf32>
    %cst_56 = arith.constant 9.99999974E-6 : f32
    %141 = vector.broadcast %cst_56 : f32 to vector<1x8xf32>
    %142 = arith.addf %138, %141 : vector<1x8xf32>
    %143 = math.rsqrt %142 : vector<1x8xf32>
    %144 = arith.mulf %140, %143 : vector<1x8xf32>
    %145 = vector.extract_strided_slice %139 {offsets = [1, 0], sizes = [1, 8], strides = [1, 1]} : vector<2x8xf32> to vector<1x8xf32>
    %146 = arith.mulf %135, %144 : vector<1x8xf32>
    %147 = arith.subf %145, %146 : vector<1x8xf32>
    %c0_i32_57 = arith.constant 0 : i32
    %148 = vector.broadcast %c0_i32_57 : i32 to vector<2x8xi32>
    %149 = arith.cmpi eq, %5, %148 : vector<2x8xi32>
    %150 = vector.shape_cast %144 : vector<1x8xf32> to vector<1x8xf32>
    %151 = vector.broadcast %150 : vector<1x8xf32> to vector<2x8xf32>
    %152 = vector.shape_cast %147 : vector<1x8xf32> to vector<1x8xf32>
    %153 = vector.broadcast %152 : vector<1x8xf32> to vector<2x8xf32>
    %154 = arith.select %149, %151, %153 : vector<2x8xi1>, vector<2x8xf32>
    %cst_58 = arith.constant dense<0.000000e+00> : vector<2x128xf32>
    %155 = tpu.matmul %154, %1, %cst_58 {dimension_numbers = #tpu.dot_dimension_numbers<[1], [0], [0], [1], [0, 0, 1, 1], [], []>} : vector<2x8xf32>, vector<8x128xf32>, vector<2x128xf32> -> vector<2x128xf32>
    %156 = vector.extract_strided_slice %155 {offsets = [0, 0], sizes = [1, 128], strides = [1, 1]} : vector<2x128xf32> to vector<1x128xf32>
    %157 = vector.broadcast %156 : vector<1x128xf32> to vector<32x128xf32>
    %158 = arith.mulf %119, %157 : vector<32x128xf32>
    %159 = vector.extract_strided_slice %155 {offsets = [1, 0], sizes = [1, 128], strides = [1, 1]} : vector<2x128xf32> to vector<1x128xf32>
    %160 = vector.broadcast %159 : vector<1x128xf32> to vector<32x128xf32>
    %161 = arith.addf %158, %160 : vector<32x128xf32>
    %162 = arith.addf %117, %161 : vector<32x128xf32>
    %cst_59 = arith.constant 0.000000e+00 : f32
    %163 = vector.broadcast %cst_59 : f32 to vector<32x128xf32>
    %164 = arith.maximumf %162, %163 : vector<32x128xf32>
    %c0_60 = arith.constant 0 : index
    %c0_61 = arith.constant 0 : index
    %165 = vector.load %arg11[%c0_60, %c0_61] : memref<32x128xf32, #tpu.memory_space<vmem>>, vector<32x128xf32>
    tpu.vector_store %arg11[%c0_60, %c0_61], %164 {strides = array<i32>} : memref<32x128xf32, #tpu.memory_space<vmem>>, vector<32x128xf32>,
    return
  }
}

</mosaic_0001>

<bundles_post_ra>
// kernel: tpu_custom_call.1
= control target key start
LH: loop header
LB: loop body
LE: loop exit
PB: predicated region body
PF: predicated region fallthrough
CT: control target
= control target key end

     0   :  { %16 = vsyncpa [#allocation3], 0  ;;  %s2838_s0 = inlined_call_operand.hbm [shape: bf16[32,128], index: 0, kind: input, shape index: {}]   ;;  %s2839_s1 = inlined_call_operand.hbm [shape: bf16[128,384], index: 1, kind: input, shape index: {}]   ;;  %s2840_s2 = inlined_call_operand.hbm [shape: bf16[128,384], index: 2, kind: input, shape index: {}]   ;;  %s2841_s3 = inlined_call_operand.vmem [shape: bf16[128,128], index: 3, kind: input, shape index: {}]   ;;  %s2842_s4 = inlined_call_operand.vmem [shape: f32[128,8], index: 4, kind: input, shape index: {}]   ;;  %s2843_s5 = inlined_call_operand.vmem [shape: f32[8,128], index: 5, kind: input, shape index: {}]   ;;  %s2844_s6 = inlined_call_operand.vmem [shape: f32[32,128], index: 6, kind: input, shape index: {}]   ;;  %s2845_s7 = inlined_call_operand.vmem [shape: f32[32,128], index: 7, kind: input, shape index: {}]   ;;  %s2846_s8 = inlined_call_operand.vmem [shape: f32[2,8], index: 8, kind: input, shape index: {}]   ;;  %s2847_s9 = inlined_call_operand.vmem [shape: f32[2,8], index: 9, kind: input, shape index: {}]   ;;  %s2848_s10 = inlined_call_operand.vmem [shape: f32[2,8], index: 10, kind: input, shape index: {}]   ;;  %s2849_s11 = inlined_call_operand.hbm [shape: f32[32,128], index: 11, kind: output, shape index: {}]  }
   0x1   :  { %17 = vsyncpa [#allocation6], 0 }
   0x2   :  { %18 = vsyncpa [#allocation4], 0  ;;  %s2329_s17 = smov [#allocation5]   ;;  %s2235_s21 = scalar_lea.hbm %s2839_s1, 3072 }
   0x3   :  { %s36_s18 = sshll.u32 %s2329_s17, 4  ;;  %p2236_p0 = scmp.ne.s32.totalorder %s2839_s1, %s2235_s21  ;;  %s37_s18 = int_to_ptr.vmem [resolvable:$true] %s36_s18 }
   0x4   :  { %p2239_p1 = scmp.lt.u32.totalorder %s2235_s21, %s2839_s1 }
   0x6   :  { %p2241_p2 = pnand %p2239_p1, %p2236_p0 }
   0x8   :  { %2244 = shalt.err (!%p2241_p2)
}
   0x9   :  { %s2245_s26 = scalar_lea.vmem %s37_s18, 3072  ;;  %p2250_p4 = scmp.lt.s32.totalorder %s37_s18, %s37_s18 }
   0xa   :  { %p2246_p3 = scmp.ne.s32.totalorder %s37_s18, %s2245_s26  ;;  %p2251_p5 = scmp.lt.s32.totalorder %s2245_s26, %s2245_s26 }
   0xc   :  { %p2252_p6 = por %p2251_p5, %p2250_p4 }
   0xe   :  { %p2253_p7 = pnand %p2252_p6, %p2246_p3 }
  0x10   :  { %2256 = shalt.err (!%p2253_p7)
}
  0x11   :  { %s2330_s27 = smov 192   ;;  %s2331_s28 = smov 12  }
  0x12   :  { %42 = dma.hbm_to_vmem [thread:$0]  %s2839_s1, 3072, %s37_s18, [#allocation6], %s2330_s27, %s2330_s27, %s2331_s28  }
  0x13   :  { %s2332_s12 = smov [#allocation2]   ;;  %s2257_s16 = scalar_lea.hbm %s2838_s0, 256 }
  0x14   :  { %s24_s13 = sshll.u32 %s2332_s12, 4  ;;  %p2258_p8 = scmp.ne.s32.totalorder %s2838_s0, %s2257_s16  ;;  %s25_s13 = int_to_ptr.vmem [resolvable:$true] %s24_s13 }
  0x15   :  { %p2261_p9 = scmp.lt.u32.totalorder %s2257_s16, %s2838_s0 }
  0x17   :  { %p2263_p10 = pnand %p2261_p9, %p2258_p8 }
  0x19   :  { %2266 = shalt.err (!%p2263_p10)
}
  0x1a   :  { %s2267_s22 = scalar_lea.vmem %s25_s13, 256  ;;  %p2272_p12 = scmp.lt.s32.totalorder %s25_s13, %s25_s13 }
  0x1b   :  { %p2268_p11 = scmp.ne.s32.totalorder %s25_s13, %s2267_s22  ;;  %p2273_p13 = scmp.lt.s32.totalorder %s2267_s22, %s2267_s22 }
  0x1d   :  { %p2274_p0 = por %p2273_p13, %p2272_p12 }
  0x1f   :  { %p2275_p1 = pnand %p2274_p0, %p2268_p11 }
  0x21   :  { %2278 = shalt.err (!%p2275_p1)
}
  0x22   :  { %s2333_s1 = smov 64   ;;  %s2334_s18 = smov 4  }
  0x23   :  { %30 = dma.hbm_to_vmem [thread:$0]  %s2838_s0, 256, %s25_s13, [#allocation3], %s2333_s1, %s2333_s1, %s2334_s18  }
  0x24   :  { %s2335_s25 = smov [#allocation7]   ;;  %s2279_s12 = scalar_lea.hbm %s2840_s2, 3072 }
  0x25   :  { %s48_s26 = sshll.u32 %s2335_s25, 4  ;;  %p2280_p2 = scmp.ne.s32.totalorder %s2840_s2, %s2279_s12  ;;  %s49_s26 = int_to_ptr.vmem [resolvable:$true] %s48_s26 }
  0x26   :  { %p2283_p3 = scmp.lt.u32.totalorder %s2279_s12, %s2840_s2 }
  0x28   :  { %p2285_p4 = pnand %p2283_p3, %p2280_p2 }
  0x2a   :  { %2288 = shalt.err (!%p2285_p4)
}
  0x2b   :  { %s2289_s19 = scalar_lea.vmem %s49_s26, 3072  ;;  %p2294_p6 = scmp.lt.s32.totalorder %s49_s26, %s49_s26 }
  0x2c   :  { %p2290_p5 = scmp.ne.s32.totalorder %s49_s26, %s2289_s19  ;;  %p2295_p7 = scmp.lt.s32.totalorder %s2289_s19, %s2289_s19 }
  0x2e   :  { %p2296_p8 = por %p2295_p7, %p2294_p6 }
  0x30   :  { %p2297_p9 = pnand %p2296_p8, %p2290_p5 }
  0x32   :  { %2300 = shalt.err (!%p2297_p9)
}
  0x33   :  { %54 = dma.hbm_to_vmem [thread:$0]  %s2840_s2, 3072, %s49_s26, [#allocation6], %s2330_s27, %s2330_s27, %s2331_s28  }
  0x34   :  { %2323 = dma.done.wait [#allocation3], 256  }
  0x35   :  { %2324 = vsyncadd [#allocation3], 4294967040 }
  0x36   :  { %2325 = dma.done.wait [#allocation6], 6144  }
  0x37   :  { %2326 = vsyncadd [#allocation6], 4294961152  ;;  %v2171_v0 = vld [vmem:[#allocation5] ss:$12 sps:$4 sm:$0xff]   ;;  %v2172_v1 = vld [vmem:[#allocation5 + $0x18] ss:$12 sps:$4 sm:$0xff]   ;;  %v106_v52 = vlaneseq }
  0x38   :  { %1826 = vmatprep.subr.bf16.mxu0 %v2171_v0  ;;  %v2173_v2 = vld [vmem:[#allocation5 + $0x4] ss:$12 sps:$4 sm:$0xff]   ;;  %v2175_v4 = vld [vmem:[#allocation5 + $0x1c] ss:$12 sps:$4 sm:$0xff]   ;;  %v2177_v5 = vld [vmem:[#allocation5 + $0x34] ss:$12 sps:$4 sm:$0xff]  }
  0x39   :  { %1827 = vmatpush3.bf16.msra.mxu0 %v2171_v0  ;;  %v2174_v3 = vld [vmem:[#allocation5 + $0x30] ss:$12 sps:$4 sm:$0xff]   ;;  %1846 = vmatprep.subr.bf16.mxu1 %v2173_v2  ;;  %v2176_v6 = vld [vmem:[#allocation5 + $0x48] ss:$12 sps:$4 sm:$0xff]   ;;  %v2179_v7 = vld [vmem:[#allocation5 + $0x4c] ss:$12 sps:$4 sm:$0xff]  }
  0x3a   :  { %1828 = vmatprep.subr.bf16.mxu0 %v2172_v1  ;;  %1847 = vmatpush3.bf16.msra.mxu1 %v2173_v2  ;;  %v2178_v8 = vld [vmem:[#allocation5 + $0x60] ss:$12 sps:$4 sm:$0xff]   ;;  %v2181_v9 = vld [vmem:[#allocation5 + $0x64] ss:$12 sps:$4 sm:$0xff]   ;;  %v2183_v12 = vld [vmem:[#allocation5 + $0x7c] ss:$12 sps:$4 sm:$0xff]  }
  0x3b   :  { %1848 = vmatprep.subr.bf16.mxu1 %v2175_v4  ;;  %v2444_v10 = vld [vmem:[#allocation2] sm:$0xff]   ;;  %v2180_v11 = vld [vmem:[#allocation5 + $0x78] ss:$12 sps:$4 sm:$0xff]   ;;  %v2190_v19 = vld [vmem:[#allocation5 + $0x20] ss:$12 sps:$4 sm:$0xff]   ;;  %v2336_v29 = vmov 0.0|0.0  }
  0x3c   :  { %1842 = vmatprep.mubr.bf16.mxu0 %v2444_v10  ;;  %1862 = vmatprep.mubr.bf16.mxu1 %v2444_v10  ;;  %v2182_v13 = vld [vmem:[#allocation5 + $0x90] ss:$12 sps:$4 sm:$0xff]   ;;  %v2185_v14 = vld [vmem:[#allocation5 + $0x94] ss:$12 sps:$4 sm:$0xff]   ;;  %v2189_v16 = vld [vmem:[#allocation5 + $0xac] ss:$12 sps:$4 sm:$0xff]  }
  0x3d   :  { %1829 = vmatpush3.bf16.msra.mxu0 %v2172_v1  ;;  %v2184_v15 = vld [vmem:[#allocation5 + $0xa8] ss:$12 sps:$4 sm:$0xff]   ;;  %v2448_v18 = vld [vmem:[#allocation2 + $0x8] sm:$0xff]   ;;  %v2194_v23 = vld [vmem:[#allocation5 + $0x80] ss:$12 sps:$4 sm:$0xff]   ;;  %vm2337_vm0 = vmmov 0  }
  0x3e   :  { %1830 = vmatprep.subr.bf16.mxu0 %v2174_v3  ;;  %1849 = vmatpush3.bf16.msra.mxu1 %v2175_v4  ;;  %v2188_v17 = vld [vmem:[#allocation5 + $0x8] ss:$12 sps:$4 sm:$0xff]   ;;  %v2191_v20 = vld [vmem:[#allocation5 + $0x38] ss:$12 sps:$4 sm:$0xff]   ;;  %v2192_v21 = vld [vmem:[#allocation5 + $0x50] ss:$12 sps:$4 sm:$0xff]  }
  0x3f   :  { %1850 = vmatprep.subr.bf16.mxu1 %v2177_v5  ;;  %v2193_v22 = vld [vmem:[#allocation5 + $0x68] ss:$12 sps:$4 sm:$0xff]   ;;  %v2195_v24 = vld [vmem:[#allocation5 + $0x98] ss:$12 sps:$4 sm:$0xff]   ;;  %v2196_v25 = vld [vmem:[#allocation5 + $0xb0] ss:$12 sps:$4 sm:$0xff]  }
  0x40   :  { %v81_v26 = vld [vmem:[%s2842_s4] sm:$0xff]  ;;  %v82_v27 = vld [vmem:[%s2842_s4 + $0x8] sm:$0xff]  ;;  %v83_v30 = vld [vmem:[%s2842_s4 + $0x10] sm:$0xff]  ;;  %v2338_v42 = vmov 0.0   ;;  %v2537_v53 = vshrl.u32 %v106_v52, 7  ;;  %vm614_vm4 = vcmask 64512  }
  0x41   :  { %1831 = vmatpush3.bf16.msra.mxu0 %v2174_v3  ;;  %v2460_v28 = vpack.c.bf16 %v82_v27, %v81_v26  ;;  %v84_v31 = vld [vmem:[%s2842_s4 + $0x18] sm:$0xff]  ;;  %v85_v33 = vld [vmem:[%s2842_s4 + $0x20] sm:$0xff]  ;;  %v86_v34 = vld [vmem:[%s2842_s4 + $0x28] sm:$0xff] }
  0x42   :  { %1832 = vmatprep.subr.bf16.mxu0 %v2176_v6  ;;  %1851 = vmatpush3.bf16.msra.mxu1 %v2177_v5  ;;  %v2471_v32 = vpack.c.bf16 %v84_v31, %v83_v30  ;;  %v2481_v35 = vpack.c.bf16 %v86_v34, %v85_v33  ;;  %v87_v36 = vld [vmem:[%s2842_s4 + $0x30] sm:$0xff]  ;;  %v88_v37 = vld [vmem:[%s2842_s4 + $0x38] sm:$0xff]  ;;  %v89_v39 = vld [vmem:[%s2842_s4 + $0x40] sm:$0xff]  ;;  %vm257_vm1 = vcmp.lt.s32.totalorder %v2537_v53, 1  ;;  %vm480_vm2 = vcmp.lt.s32.totalorder %v2537_v53, 7 }
  0x43   :  { %1852 = vmatprep.subr.bf16.mxu1 %v2179_v7  ;;  %v2491_v38 = vpack.c.bf16 %v88_v37, %v87_v36  ;;  %v90_v40 = vld [vmem:[%s2842_s4 + $0x48] sm:$0xff]  ;;  %v91_v43 = vld [vmem:[%s2842_s4 + $0x50] sm:$0xff]  ;;  %v92_v44 = vld [vmem:[%s2842_s4 + $0x58] sm:$0xff]  ;;  %vm515_vm3 = vcmp.eq.s32.totalorder %v2537_v53, 0 }
  0x44   :  { %v2500_v41 = vpack.c.bf16 %v90_v40, %v89_v39  ;;  %v2512_v45 = vpack.c.bf16 %v92_v44, %v91_v43  ;;  %v93_v46 = vld [vmem:[%s2842_s4 + $0x60] sm:$0xff]  ;;  %v94_v47 = vld [vmem:[%s2842_s4 + $0x68] sm:$0xff]  ;;  %v95_v49 = vld [vmem:[%s2842_s4 + $0x70] sm:$0xff] }
  0x45   :  { %1833 = vmatpush3.bf16.msra.mxu0 %v2176_v6  ;;  %v2522_v48 = vpack.c.bf16 %v94_v47, %v93_v46  ;;  %v96_v50 = vld [vmem:[%s2842_s4 + $0x78] sm:$0xff]  ;;  %v2543_v62 = vld [vmem:[%s2844_s6] sm:$0xff]  ;;  %v2553_v2 = vld [vmem:[%s2844_s6 + $0x10] sm:$0xff] }
  0x46   :  { %1834 = vmatprep.subr.bf16.mxu0 %v2178_v8  ;;  %1853 = vmatpush3.bf16.msra.mxu1 %v2179_v7  ;;  %v2532_v51 = vpack.c.bf16 %v96_v50, %v95_v49  ;;  %v2548_v0 = vld [vmem:[%s2844_s6 + $0x18] sm:$0xff]  ;;  %v2558_v4 = vld [vmem:[%s2844_s6 + $0x8] sm:$0xff]  ;;  %v2586_v31 = vld [vmem:[%s2845_s7] sm:$0xff] }
  0x47   :  { %1854 = vmatprep.subr.bf16.mxu1 %v2181_v9  ;;  %v2581_v26 = vld [vmem:[%s2845_s7 + $0x18] sm:$0xff]  ;;  %v2591_v33 = vld [vmem:[%s2845_s7 + $0x8] sm:$0xff] }
  0x49   :  { %1835 = vmatpush3.bf16.msra.mxu0 %v2178_v8 }
  0x4a   :  { %1836 = vmatprep.subr.bf16.mxu0 %v2180_v11  ;;  %1855 = vmatpush3.bf16.msra.mxu1 %v2181_v9 }
  0x4b   :  { %1856 = vmatprep.subr.bf16.mxu1 %v2183_v12 }
  0x4d   :  { %1837 = vmatpush3.bf16.msra.mxu0 %v2180_v11 }
  0x4e   :  { %1838 = vmatprep.subr.bf16.mxu0 %v2182_v13  ;;  %1857 = vmatpush3.bf16.msra.mxu1 %v2183_v12 }
  0x4f   :  { %1858 = vmatprep.subr.bf16.mxu1 %v2185_v14 }
  0x51   :  { %1839 = vmatpush3.bf16.msra.mxu0 %v2182_v13 }
  0x52   :  { %1840 = vmatprep.subr.bf16.mxu0 %v2184_v15  ;;  %1859 = vmatpush3.bf16.msra.mxu1 %v2185_v14 }
  0x53   :  { %1860 = vmatprep.subr.bf16.mxu1 %v2189_v16 }
  0x55   :  { %1841 = vmatpush3.bf16.msra.mxu0 %v2184_v15 }
  0x56   :  { %1866 = vmatprep.subr.bf16.mxu0 %v2188_v17  ;;  %1861 = vmatpush3.bf16.msra.mxu1 %v2189_v16 }
  0x57   :  { %2086 = vmatprep.subr.bf16.mxu1 %v2336_v29 }
  0x58   :  { %1843 = vmatmul.mubr.bf16.vlgmr.msra.gmra.mrb[0].mxu0 %v2448_v18 }
  0x59   :  { %1867 = vmatpush3.bf16.msra.mxu0 %v2188_v17  ;;  %1882 = vmatprep.mubr.bf16.mxu0 %v2444_v10 }
  0x5a   :  { %1868 = vmatprep.subr.bf16.mxu0 %v2190_v19  ;;  %1863 = vmatmul.mubr.bf16.vlgmr.msra.gmra.mrb[0].mxu1 %v2448_v18 }
  0x5b   :  { %2088 = vmatpush3.bf16.msra.mxu1 %v2460_v28  ;;  %1918 = vmatprep.mubr.msk.f32.mxu1 %vm2337_vm0, %v2338_v42 }
  0x5c   :  { %2089 = vmatprep.subr.bf16.mxu1 %v2336_v29 }
  0x5d   :  { %1869 = vmatpush3.bf16.msra.mxu0 %v2190_v19 }
  0x5e   :  { %1870 = vmatprep.subr.bf16.mxu0 %v2191_v20 }
  0x5f   :  { %2091 = vmatpush3.bf16.msra.mxu1 %v2471_v32 }
  0x60   :  { %2092 = vmatprep.subr.bf16.mxu1 %v2336_v29 }
  0x61   :  { %1871 = vmatpush3.bf16.msra.mxu0 %v2191_v20 }
  0x62   :  { %1872 = vmatprep.subr.bf16.mxu0 %v2192_v21 }
  0x63   :  { %2094 = vmatpush3.bf16.msra.mxu1 %v2481_v35 }
  0x64   :  { %2095 = vmatprep.subr.bf16.mxu1 %v2336_v29 }
  0x65   :  { %1873 = vmatpush3.bf16.msra.mxu0 %v2192_v21 }
  0x66   :  { %1874 = vmatprep.subr.bf16.mxu0 %v2193_v22 }
  0x67   :  { %2097 = vmatpush3.bf16.msra.mxu1 %v2491_v38 }
  0x68   :  { %2098 = vmatprep.subr.bf16.mxu1 %v2336_v29 }
  0x69   :  { %1875 = vmatpush3.bf16.msra.mxu0 %v2193_v22 }
  0x6a   :  { %1876 = vmatprep.subr.bf16.mxu0 %v2194_v23 }
  0x6b   :  { %2100 = vmatpush3.bf16.msra.mxu1 %v2500_v41 }
  0x6c   :  { %2101 = vmatprep.subr.bf16.mxu1 %v2336_v29 }
  0x6d   :  { %1877 = vmatpush3.bf16.msra.mxu0 %v2194_v23 }
  0x6e   :  { %1878 = vmatprep.subr.bf16.mxu0 %v2195_v24 }
  0x6f   :  { %2103 = vmatpush3.bf16.msra.mxu1 %v2512_v45 }
  0x70   :  { %2104 = vmatprep.subr.bf16.mxu1 %v2336_v29 }
  0x71   :  { %1879 = vmatpush3.bf16.msra.mxu0 %v2195_v24 }
  0x72   :  { %1880 = vmatprep.subr.bf16.mxu0 %v2196_v25 }
  0x73   :  { %2106 = vmatpush3.bf16.msra.mxu1 %v2522_v48 }
  0x74   :  { %2107 = vmatprep.subr.bf16.mxu1 %v2336_v29 }
  0x75   :  { %1881 = vmatpush3.bf16.msra.mxu0 %v2196_v25  ;;  %v2576_v25 = vld [vmem:[%s2845_s7 + $0x10] sm:$0xff] }
  0x77   :  { %2109 = vmatpush3.bf16.msra.mxu1 %v2532_v51 }
  0x78   :  { %1883 = vmatmul.mubr.bf16.vlgmr.msra.gmra.mrb[4].mxu0 %v2448_v18  ;;  %1921 = vmatprep.subr.mxu1 %v2338_v42 }
 0x12b   :  { %v1844_v54 = vpop.f32.mrb[0].mxu0 }
 0x12c   :  { %v255_v55 = vrot.slane %v1844_v54, 7  ;;  %v238_v56 = vpop.f32.mrb[1].mxu0 }
 0x12d   :  { %v253_v57 = vrot.slane %v238_v56, 7  ;;  %v1845_v58 = vpop.f32.mrb[2].mxu0  ;;  %v1864_v59 = vpop.f32.mrb[0].mxu1 }
 0x12e   :  { %v256_v60 = vrot.slane %v1845_v58, 7  ;;  %v241_v61 = vpop.f32.mrb[3].mxu0  ;;  %v348_v63 = vpop.f32.mrb[1].mxu1 }
 0x12f   :  { %v254_v1 = vrot.slane %v241_v61, 7  ;;  %v1865_v3 = vpop.f32.mrb[2].mxu1 }
 0x130   :  { %v261_v5 = vsel %vm257_vm1, %v256_v60, %v253_v57  ;;  %v258_v6 = vsel %vm257_vm1, %v255_v55, %v256_v60  ;;  %v351_v7 = vpop.f32.mrb[3].mxu1 }
 0x131   :  { %v259_v8 = vsel %vm257_vm1, %v254_v1, %v255_v55  ;;  %v262_v9 = vmul.f32 %v261_v5, %v2543_v62  ;;  %v265_v11 = vmul.f32 %v258_v6, %v2548_v0  ;;  %v260_v12 = vsel %vm257_vm1, %v253_v57, %v254_v1 }
 0x132   :  { %v264_v13 = vmul.f32 %v259_v8, %v2553_v2  ;;  %v263_v14 = vmul.f32 %v260_v12, %v2558_v4 }
 0x133   :  { %v349_v15 = vadd.f32 %v348_v63, %v262_v9  ;;  %v360_v16 = vadd.f32 %v1865_v3, %v265_v11 }
 0x134   :  { %v357_v17 = vadd.f32 %v1864_v59, %v264_v13  ;;  %v352_v19 = vadd.f32 %v351_v7, %v263_v14 }
 0x14b   :  { %v1884_v20 = vpop.f32.mrb[4].mxu0 }
 0x14c   :  { %v461_v21 = vpop.f32.mrb[5].mxu0  ;;  %v478_v24 = vrot.slane %v1884_v20, 1  ;;  %v2633_v20 = vld [vmem:[%s2843_s5] sm:$0xff] }
 0x14d   :  { %v476_v22 = vrot.slane %v461_v21, 1  ;;  %v1885_v23 = vpop.f32.mrb[6].mxu0  ;;  %v2197_v21 = vld [vmem:[#allocation7] ss:$12 sps:$4 sm:$0xff]  }
 0x14e   :  { %v479_v27 = vrot.slane %v1885_v23, 1  ;;  %v464_v30 = vpop.f32.mrb[7].mxu0  ;;  %v2199_v23 = vld [vmem:[#allocation7 + $0x18] ss:$12 sps:$4 sm:$0xff]   ;;  %1926 = vmatprep.subr.bf16.mxu0 %v2197_v21 }
 0x14f   :  { %v477_v34 = vrot.slane %v464_v30, 1  ;;  %1927 = vmatpush3.bf16.msra.mxu0 %v2197_v21  ;;  %v2205_v30 = vld [vmem:[#allocation7 + $0x60] ss:$12 sps:$4 sm:$0xff]  }
 0x150   :  { %v481_v36 = vsel %vm480_vm2, %v478_v24, %v479_v27  ;;  %v484_v37 = vsel %vm480_vm2, %v479_v27, %v476_v22  ;;  %1928 = vmatprep.subr.bf16.mxu0 %v2199_v23  ;;  %v2203_v27 = vld [vmem:[#allocation7 + $0x48] ss:$12 sps:$4 sm:$0xff]  }
 0x151   :  { %v487_v39 = vmul.f32 %v481_v36, %v2576_v25  ;;  %v488_v40 = vmul.f32 %v484_v37, %v2581_v26  ;;  %v482_v43 = vsel %vm480_vm2, %v477_v34, %v478_v24  ;;  %v483_v44 = vsel %vm480_vm2, %v476_v22, %v477_v34  ;;  %v2198_v22 = vld [vmem:[#allocation7 + $0x4] ss:$12 sps:$4 sm:$0xff]  }
 0x152   :  { %v485_v46 = vmul.f32 %v483_v44, %v2586_v31  ;;  %v486_v47 = vmul.f32 %v482_v43, %v2591_v33  ;;  %v2201_v24 = vld [vmem:[#allocation7 + $0x30] ss:$12 sps:$4 sm:$0xff]   ;;  %v2207_v34 = vld [vmem:[#allocation7 + $0x78] ss:$12 sps:$4 sm:$0xff]  }
 0x153   :  { %v2605_v49 = vadd.f32 %v487_v39, %v357_v17  ;;  %v2607_v50 = vadd.f32 %v488_v40, %v360_v16  ;;  %1929 = vmatpush3.bf16.msra.mxu0 %v2199_v23 }
 0x154   :  { %v2609_v52 = vadd.f32 %v485_v46, %v349_v15  ;;  %v2611_v54 = vadd.f32 %v486_v47, %v352_v19  ;;  %1930 = vmatprep.subr.bf16.mxu0 %v2201_v24 }
 0x155   :  { %v504_v58 = vmul.f32 %v2605_v49, %v2605_v49  ;;  %v505_v61 = vmul.f32 %v2607_v50, %v2607_v50 }
 0x156   :  { %v493_v55 = vadd.f32 %v2611_v54, %v2609_v52  ;;  %v502_v56 = vmul.f32 %v2609_v52, %v2609_v52  ;;  %v503_v57 = vmul.f32 %v2611_v54, %v2611_v54 }
 0x157   :  { %1931 = vmatpush3.bf16.msra.mxu0 %v2201_v24 }
 0x158   :  { %v494_v59 = vadd.f32 %v493_v55, %v2605_v49  ;;  %v506_v60 = vadd.f32 %v503_v57, %v502_v56  ;;  %1932 = vmatprep.subr.bf16.mxu0 %v2203_v27  ;;  %v593_v55 = vld [vmem:[%s2846_s8] sm:$0x3] }
 0x15a   :  { %v495_v63 = vadd.f32 %v494_v59, %v2607_v50  ;;  %v507_v1 = vadd.f32 %v506_v60, %v504_v58  ;;  %v2640_v60 = vsub.s32 0, %v2537_v53 }
 0x15b   :  { %1933 = vmatpush3.bf16.msra.mxu0 %v2203_v27 }
 0x15c   :  { %v496_v3 = vrot.slane %v495_v63, 4  ;;  %v508_v5 = vadd.f32 %v507_v1, %v505_v61  ;;  %1934 = vmatprep.subr.bf16.mxu0 %v2205_v30  ;;  %v2643_v61 = vsub.s32 1, %v2537_v53 }
 0x15e   :  { %v497_v6 = vadd.f32 %v496_v3, %v495_v63  ;;  %v509_v7 = vrot.slane %v508_v5, 4 }
 0x15f   :  { %1935 = vmatpush3.bf16.msra.mxu0 %v2205_v30 }
 0x160   :  { %v498_v8 = vrot.slane %v497_v6, 2  ;;  %v510_v9 = vadd.f32 %v509_v7, %v508_v5  ;;  %1936 = vmatprep.subr.bf16.mxu0 %v2207_v34  ;;  %v2200_v5 = vld [vmem:[#allocation7 + $0x1c] ss:$12 sps:$4 sm:$0xff]   ;;  %v2202_v7 = vld [vmem:[#allocation7 + $0x34] ss:$12 sps:$4 sm:$0xff]  }
 0x162   :  { %v499_v11 = vadd.f32 %v498_v8, %v497_v6  ;;  %v511_v12 = vrot.slane %v510_v9, 2  ;;  %v2204_v8 = vld [vmem:[#allocation7 + $0x4c] ss:$12 sps:$4 sm:$0xff]  }
 0x163   :  { %1937 = vmatpush3.bf16.msra.mxu0 %v2207_v34 }
 0x164   :  { %v500_v13 = vrot.slane %v499_v11, 1  ;;  %v512_v14 = vadd.f32 %v511_v12, %v510_v9  ;;  %v2206_v9 = vld [vmem:[#allocation7 + $0x64] ss:$12 sps:$4 sm:$0xff]  }
 0x165   :  { %v2209_v12 = vld [vmem:[#allocation7 + $0x90] ss:$12 sps:$4 sm:$0xff]  }
 0x166   :  { %v513_v15 = vrot.slane %v512_v14, 1  ;;  %v501_v16 = vadd.f32 %v500_v13, %v499_v11  ;;  %v2208_v11 = vld [vmem:[#allocation7 + $0x7c] ss:$12 sps:$4 sm:$0xff]   ;;  %v2210_v13 = vld [vmem:[#allocation7 + $0x94] ss:$12 sps:$4 sm:$0xff]   ;;  %1938 = vmatprep.subr.bf16.mxu0 %v2209_v12 }
 0x167   :  { %1939 = vmatpush3.bf16.msra.mxu0 %v2209_v12 }
 0x168   :  { %v514_v17 = vadd.f32 %v513_v15, %v512_v14  ;;  %v2211_v14 = vld [vmem:[#allocation7 + $0xa8] ss:$12 sps:$4 sm:$0xff]   ;;  %v2212_v15 = vld [vmem:[#allocation7 + $0xac] ss:$12 sps:$4 sm:$0xff]  }
 0x169   :  { %1940 = vmatprep.subr.bf16.mxu0 %v2211_v14 }
 0x16a   :  { %v516_v19 = vsel %vm515_vm3, %v501_v16, %v514_v17  ;;  %v2213_v16 = vld [vmem:[#allocation7 + $0x8] ss:$12 sps:$4 sm:$0xff]  }
 0x16b   :  { %1919 = vmatmul.mubr.f32.vlgmr.msra.gmra.mrb[4].mxu1 %v516_v19  ;;  %1941 = vmatpush3.bf16.msra.mxu0 %v2211_v14 }
 0x16c   :  { %1923 = vmatprep.mubr.msk.f32.mxu1 %vm2337_vm0, %v2338_v42  ;;  %1922 = vmatpush3.msra.mxu1 %v2633_v20 }
 0x16d   :  { %1946 = vmatprep.subr.bf16.mxu1 %v2198_v22  ;;  %1966 = vmatprep.subr.bf16.mxu0 %v2213_v16 }
 0x23e   :  { %v583_v36 = vpop.f32.mrb[4].mxu1 }
 0x23f   :  { %v587_v37 = vmul.f32 0.001953125, %v583_v36  ;;  %v1920_v39 = vpop.f32.mrb[5].mxu1 }
 0x241   :  { %v588_v40 = vmul.f32 %v587_v37, %v587_v37 }
 0x243   :  { %v590_v43 = vrot.slane %v588_v40, 7 }
 0x245   :  { %v592_v44 = vsub.f32 %v587_v37, %v590_v43 }
 0x247   :  { %v594_v46 = vadd.f32 1e-05, %v592_v44 }
 0x249   :  { %2229 = vrsqrt.f32 %v594_v46 }
 0x253   :  { %v2230_v47 = vpop.eup %2229 }
 0x254   :  { %v597_v56 = vrot.slane %v2230_v47, 1 }
 0x256   :  { %v599_v57 = vmul.f32 %v597_v56, %v593_v55  ;;  %v2214_v56 = vld [vmem:[#allocation7 + $0x20] ss:$12 sps:$4 sm:$0xff]  }
 0x258   :  { %v600_v58 = vmul.f32 %v599_v57, %v587_v37  ;;  %v608_v1 = vrot.slane %v599_v57, %v2640_v60  ;;  %v2219_v57 = vld [vmem:[#allocation7 + $0x98] ss:$12 sps:$4 sm:$0xff]  }
 0x25a   :  { %v602_v59 = vrot.slane %v600_v58, 7  ;;  %v2220_v58 = vld [vmem:[#allocation7 + $0xb0] ss:$12 sps:$4 sm:$0xff]  }
 0x25c   :  { %v604_v63 = vsub.f32 %v593_v55, %v602_v59  ;;  %v2682_v59 = vld [vmem:[%s2841_s3] sm:$0xff]  }
 0x25e   :  { %v612_v3 = vrot.slane %v604_v63, %v2643_v61 }
 0x260   :  { %v613_v6 = vsel %vm515_vm3, %v608_v1, %v612_v3 }
 0x261   :  { %1924 = vmatmul.mubr.msk.f32.vlgmr.msra.gmra.mrb[6].mxu1 %vm614_vm4, %v613_v6 }
 0x262   :  { %1947 = vmatpush3.bf16.msra.mxu1 %v2198_v22 }
 0x263   :  { %1948 = vmatprep.subr.bf16.mxu1 %v2200_v5 }
 0x266   :  { %1949 = vmatpush3.bf16.msra.mxu1 %v2200_v5 }
 0x267   :  { %1950 = vmatprep.subr.bf16.mxu1 %v2202_v7 }
 0x26a   :  { %1951 = vmatpush3.bf16.msra.mxu1 %v2202_v7 }
 0x26b   :  { %1952 = vmatprep.subr.bf16.mxu1 %v2204_v8 }
 0x26e   :  { %1953 = vmatpush3.bf16.msra.mxu1 %v2204_v8 }
 0x26f   :  { %1954 = vmatprep.subr.bf16.mxu1 %v2206_v9 }
 0x272   :  { %1955 = vmatpush3.bf16.msra.mxu1 %v2206_v9 }
 0x273   :  { %1956 = vmatprep.subr.bf16.mxu1 %v2208_v11 }
 0x276   :  { %1957 = vmatpush3.bf16.msra.mxu1 %v2208_v11 }
 0x277   :  { %1958 = vmatprep.subr.bf16.mxu1 %v2210_v13 }
 0x27a   :  { %1959 = vmatpush3.bf16.msra.mxu1 %v2210_v13 }
 0x27b   :  { %1960 = vmatprep.subr.bf16.mxu1 %v2212_v15 }
 0x27e   :  { %1961 = vmatpush3.bf16.msra.mxu1 %v2212_v15 }
 0x27f   :  { %2110 = vmatprep.subr.bf16.mxu1 %v2336_v29 }
 0x334   :  { %v684_v17 = vpop.f32.mrb[6].mxu1 }
 0x335   :  { %v691_v19 = vrot.slane %v684_v17, %v2640_v60  ;;  %v1925_v21 = vpop.f32.mrb[7].mxu1  ;;  %v699_v22 = vrot.slane %v684_v17, %v2643_v61 }
 0x337   :  { %v694_v23 = vmul.f32 %v691_v19, %v2605_v49  ;;  %v695_v24 = vmul.f32 %v691_v19, %v2607_v50  ;;  %v692_v27 = vmul.f32 %v691_v19, %v2609_v52  ;;  %v693_v30 = vmul.f32 %v691_v19, %v2611_v54  ;;  %v2215_v49 = vld [vmem:[#allocation7 + $0x38] ss:$12 sps:$4 sm:$0xff]   ;;  %v2216_v50 = vld [vmem:[#allocation7 + $0x50] ss:$12 sps:$4 sm:$0xff]   ;;  %v2217_v52 = vld [vmem:[#allocation7 + $0x68] ss:$12 sps:$4 sm:$0xff]  }
 0x338   :  { %v2218_v54 = vld [vmem:[#allocation7 + $0x80] ss:$12 sps:$4 sm:$0xff]  }
 0x339   :  { %v702_v34 = vadd.f32 %v699_v22, %v694_v23  ;;  %v703_v36 = vadd.f32 %v699_v22, %v695_v24  ;;  %v700_v37 = vadd.f32 %v699_v22, %v692_v27  ;;  %v701_v39 = vadd.f32 %v699_v22, %v693_v30 }
 0x33b   :  { %v704_v40 = vmax.f32 %v700_v37, 0.0  ;;  %v705_v43 = vmax.f32 %v701_v39, 0.0  ;;  %v706_v44 = vmax.f32 %v702_v34, 0.0  ;;  %v707_v46 = vmax.f32 %v703_v36, 0.0 }
 0x33d   :  { %v708_v47 = vpack.c.bf16 %v705_v43, %v704_v40  ;;  %v709_v55 = vpack.c.bf16 %v707_v46, %v706_v44 }
 0x33f   :  { %1942 = vmatprep.mubr.bf16.mxu0 %v708_v47  ;;  %1962 = vmatprep.mubr.bf16.mxu1 %v708_v47 }
 0x340   :  { %1943 = vmatmul.mubr.bf16.vlgmr.msra.gmra.mrb[8].mxu0 %v709_v55  ;;  %1963 = vmatmul.mubr.bf16.vlgmr.msra.gmra.mrb[8].mxu1 %v709_v55 }
 0x341   :  { %1967 = vmatpush3.bf16.msra.mxu0 %v2213_v16  ;;  %1982 = vmatprep.mubr.bf16.mxu0 %v708_v47 }
 0x342   :  { %1968 = vmatprep.subr.bf16.mxu0 %v2214_v56  ;;  %2112 = vmatpush3.bf16.msra.mxu1 %v2460_v28 }
 0x343   :  { %2113 = vmatprep.subr.bf16.mxu1 %v2336_v29  ;;  %2018 = vmatprep.mubr.msk.f32.mxu1 %vm2337_vm0, %v2338_v42 }
 0x345   :  { %1969 = vmatpush3.bf16.msra.mxu0 %v2214_v56 }
 0x346   :  { %1970 = vmatprep.subr.bf16.mxu0 %v2215_v49  ;;  %2115 = vmatpush3.bf16.msra.mxu1 %v2471_v32 }
 0x347   :  { %2116 = vmatprep.subr.bf16.mxu1 %v2336_v29 }
 0x349   :  { %1971 = vmatpush3.bf16.msra.mxu0 %v2215_v49 }
 0x34a   :  { %1972 = vmatprep.subr.bf16.mxu0 %v2216_v50  ;;  %2118 = vmatpush3.bf16.msra.mxu1 %v2481_v35 }
 0x34b   :  { %2119 = vmatprep.subr.bf16.mxu1 %v2336_v29 }
 0x34d   :  { %1973 = vmatpush3.bf16.msra.mxu0 %v2216_v50 }
 0x34e   :  { %1974 = vmatprep.subr.bf16.mxu0 %v2217_v52  ;;  %2121 = vmatpush3.bf16.msra.mxu1 %v2491_v38 }
 0x34f   :  { %2122 = vmatprep.subr.bf16.mxu1 %v2336_v29 }
 0x351   :  { %1975 = vmatpush3.bf16.msra.mxu0 %v2217_v52 }
 0x352   :  { %1976 = vmatprep.subr.bf16.mxu0 %v2218_v54  ;;  %2124 = vmatpush3.bf16.msra.mxu1 %v2500_v41 }
 0x353   :  { %2125 = vmatprep.subr.bf16.mxu1 %v2336_v29 }
 0x355   :  { %1977 = vmatpush3.bf16.msra.mxu0 %v2218_v54 }
 0x356   :  { %1978 = vmatprep.subr.bf16.mxu0 %v2219_v57  ;;  %2127 = vmatpush3.bf16.msra.mxu1 %v2512_v45 }
 0x357   :  { %2128 = vmatprep.subr.bf16.mxu1 %v2336_v29 }
 0x359   :  { %1979 = vmatpush3.bf16.msra.mxu0 %v2219_v57 }
 0x35a   :  { %1980 = vmatprep.subr.bf16.mxu0 %v2220_v58  ;;  %2130 = vmatpush3.bf16.msra.mxu1 %v2522_v48 }
 0x35b   :  { %2131 = vmatprep.subr.bf16.mxu1 %v2336_v29 }
 0x35d   :  { %1981 = vmatpush3.bf16.msra.mxu0 %v2220_v58 }
 0x35e   :  { %2133 = vmatpush3.bf16.msra.mxu1 %v2532_v51  ;;  %2021 = vmatprep.subr.mxu0 %v2338_v42 }
 0x35f   :  { %2026 = vmatprep.subr.bf16.mxu1 %v2682_v59 }
 0x360   :  { %1983 = vmatmul.mubr.bf16.vlgmr.msra.gmra.mrb[12].mxu0 %v709_v55 }
 0x361   :  { %2022 = vmatpush3.msra.mxu0 %v2633_v20  ;;  %2023 = vmatprep.mubr.msk.f32.mxu0 %vm2337_vm0, %v2338_v42 }
 0x362   :  { %2134 = vmatprep.subr.bf16.mxu0 %v2336_v29 }
 0x413   :  { %v1944_v63 = vpop.f32.mrb[8].mxu0  ;;  %v1964_v1 = vpop.f32.mrb[8].mxu1 }
 0x414   :  { %v824_v3 = vpop.f32.mrb[9].mxu0  ;;  %v933_v5 = vpop.f32.mrb[9].mxu1  ;;  %v841_v9 = vrot.slane %v1944_v63, 7 }
 0x415   :  { %v839_v6 = vrot.slane %v824_v3, 7  ;;  %v1945_v7 = vpop.f32.mrb[10].mxu0  ;;  %v1965_v8 = vpop.f32.mrb[10].mxu1 }
 0x416   :  { %v842_v11 = vrot.slane %v1945_v7, 7  ;;  %v827_v12 = vpop.f32.mrb[11].mxu0  ;;  %v936_v13 = vpop.f32.mrb[11].mxu1 }
 0x417   :  { %v840_v14 = vrot.slane %v827_v12, 7 }
 0x418   :  { %v846_v15 = vsel %vm257_vm1, %v842_v11, %v839_v6  ;;  %v843_v16 = vsel %vm257_vm1, %v841_v9, %v842_v11 }
 0x419   :  { %v847_v17 = vmul.f32 %v846_v15, %v2543_v62  ;;  %v850_v19 = vmul.f32 %v843_v16, %v2548_v0  ;;  %v844_v21 = vsel %vm257_vm1, %v840_v14, %v841_v9  ;;  %v845_v22 = vsel %vm257_vm1, %v839_v6, %v840_v14 }
 0x41a   :  { %v849_v23 = vmul.f32 %v844_v21, %v2553_v2  ;;  %v848_v24 = vmul.f32 %v845_v22, %v2558_v4 }
 0x41b   :  { %v934_v27 = vadd.f32 %v933_v5, %v847_v17  ;;  %v945_v30 = vadd.f32 %v1965_v8, %v850_v19 }
 0x41c   :  { %v942_v34 = vadd.f32 %v1964_v1, %v849_v23  ;;  %v937_v36 = vadd.f32 %v936_v13, %v848_v24  ;;  %v2222_v24 = vld [vmem:[%s2841_s3 + $0x8] sm:$0xff]  }
 0x433   :  { %v1984_v37 = vpop.f32.mrb[12].mxu0 }
 0x434   :  { %v1046_v39 = vpop.f32.mrb[13].mxu0  ;;  %v1063_v43 = vrot.slane %v1984_v37, 1  ;;  %v2228_v37 = vld [vmem:[%s2841_s3 + $0x38] sm:$0xff]  }
 0x435   :  { %v1061_v40 = vrot.slane %v1046_v39, 1  ;;  %v1985_v62 = vpop.f32.mrb[14].mxu0 }
 0x436   :  { %v1064_v0 = vrot.slane %v1985_v62, 1  ;;  %v1049_v44 = vpop.f32.mrb[15].mxu0 }
 0x437   :  { %v1062_v46 = vrot.slane %v1049_v44, 1 }
 0x438   :  { %v1065_v47 = vsel %vm480_vm2, %v1063_v43, %v1064_v0  ;;  %v1068_v2 = vsel %vm480_vm2, %v1064_v0, %v1061_v40 }
 0x439   :  { %v1071_v4 = vmul.f32 %v1065_v47, %v2576_v25  ;;  %v1072_v55 = vmul.f32 %v1068_v2, %v2581_v26  ;;  %v1066_v56 = vsel %vm480_vm2, %v1062_v46, %v1063_v43  ;;  %v1067_v49 = vsel %vm480_vm2, %v1061_v40, %v1062_v46  ;;  %v1176_v2 = vld [vmem:[%s2847_s9] sm:$0x3] }
 0x43a   :  { %v1069_v50 = vmul.f32 %v1067_v49, %v2586_v31  ;;  %v1070_v52 = vmul.f32 %v1066_v56, %v2591_v33 }
 0x43b   :  { %v2709_v54 = vadd.f32 %v1071_v4, %v942_v34  ;;  %v2711_v57 = vadd.f32 %v1072_v55, %v945_v30  ;;  %v2223_v30 = vld [vmem:[%s2841_s3 + $0x10] sm:$0xff]   ;;  %v2224_v34 = vld [vmem:[%s2841_s3 + $0x18] sm:$0xff]  }
 0x43c   :  { %v2713_v58 = vadd.f32 %v1069_v50, %v934_v27  ;;  %v2715_v63 = vadd.f32 %v1070_v52, %v937_v36  ;;  %v2225_v36 = vld [vmem:[%s2841_s3 + $0x20] sm:$0xff]  }
 0x43d   :  { %v1088_v31 = vmul.f32 %v2709_v54, %v2709_v54  ;;  %v1089_v5 = vmul.f32 %v2711_v57, %v2711_v57 }
 0x43e   :  { %v1077_v25 = vadd.f32 %v2715_v63, %v2713_v58  ;;  %v1086_v26 = vmul.f32 %v2713_v58, %v2713_v58  ;;  %v1087_v1 = vmul.f32 %v2715_v63, %v2715_v63 }
 0x440   :  { %v1078_v33 = vadd.f32 %v1077_v25, %v2709_v54  ;;  %v1090_v3 = vadd.f32 %v1087_v1, %v1086_v26 }
 0x442   :  { %v1079_v6 = vadd.f32 %v1078_v33, %v2711_v57  ;;  %v1091_v7 = vadd.f32 %v1090_v3, %v1088_v31 }
 0x444   :  { %v1080_v8 = vrot.slane %v1079_v6, 4  ;;  %v1092_v9 = vadd.f32 %v1091_v7, %v1089_v5 }
 0x446   :  { %v1081_v11 = vadd.f32 %v1080_v8, %v1079_v6  ;;  %v1093_v12 = vrot.slane %v1092_v9, 4 }
 0x448   :  { %v1082_v13 = vrot.slane %v1081_v11, 2  ;;  %v1094_v14 = vadd.f32 %v1093_v12, %v1092_v9 }
 0x44a   :  { %v1083_v15 = vadd.f32 %v1082_v13, %v1081_v11  ;;  %v1095_v16 = vrot.slane %v1094_v14, 2 }
 0x44c   :  { %v1084_v17 = vrot.slane %v1083_v15, 1  ;;  %v1096_v19 = vadd.f32 %v1095_v16, %v1094_v14 }
 0x44e   :  { %v1097_v21 = vrot.slane %v1096_v19, 1  ;;  %v1085_v22 = vadd.f32 %v1084_v17, %v1083_v15 }
 0x450   :  { %v1098_v23 = vadd.f32 %v1097_v21, %v1096_v19 }
 0x452   :  { %v1099_v27 = vsel %vm515_vm3, %v1085_v22, %v1098_v23 }
 0x453   :  { %2019 = vmatmul.mubr.f32.vlgmr.msra.gmra.mrb[12].mxu1 %v1099_v27 }
 0x454   :  { %2027 = vmatpush3.bf16.msra.mxu1 %v2682_v59  ;;  %2042 = vmatprep.mubr.bf16.mxu1 %v2444_v10  ;;  %v2226_v10 = vld [vmem:[%s2841_s3 + $0x28] sm:$0xff]   ;;  %v2227_v59 = vld [vmem:[%s2841_s3 + $0x30] sm:$0xff]  }
 0x455   :  { %2028 = vmatprep.subr.bf16.mxu1 %v2222_v24 }
 0x458   :  { %2029 = vmatpush3.bf16.msra.mxu1 %v2222_v24 }
 0x459   :  { %2030 = vmatprep.subr.bf16.mxu1 %v2223_v30 }
 0x45c   :  { %2031 = vmatpush3.bf16.msra.mxu1 %v2223_v30 }
 0x45d   :  { %2032 = vmatprep.subr.bf16.mxu1 %v2224_v34 }
 0x460   :  { %2033 = vmatpush3.bf16.msra.mxu1 %v2224_v34 }
 0x461   :  { %2034 = vmatprep.subr.bf16.mxu1 %v2225_v36 }
 0x464   :  { %2035 = vmatpush3.bf16.msra.mxu1 %v2225_v36 }
 0x465   :  { %2036 = vmatprep.subr.bf16.mxu1 %v2226_v10 }
 0x468   :  { %2037 = vmatpush3.bf16.msra.mxu1 %v2226_v10 }
 0x469   :  { %2038 = vmatprep.subr.bf16.mxu1 %v2227_v59 }
 0x46c   :  { %2039 = vmatpush3.bf16.msra.mxu1 %v2227_v59 }
 0x46d   :  { %2040 = vmatprep.subr.bf16.mxu1 %v2228_v37 }
 0x470   :  { %2041 = vmatpush3.bf16.msra.mxu1 %v2228_v37 }
 0x473   :  { %2043 = vmatmul.mubr.bf16.vlgmr.msra.gmra.mrb[16].mxu1 %v2448_v18 }
 0x526   :  { %v1166_v39 = vpop.f32.mrb[12].mxu1 }
 0x527   :  { %v1170_v40 = vmul.f32 0.001953125, %v1166_v39  ;;  %v2020_v62 = vpop.f32.mrb[13].mxu1 }
 0x529   :  { %v1171_v43 = vmul.f32 %v1170_v40, %v1170_v40 }
 0x52b   :  { %v1173_v0 = vrot.slane %v1171_v43, 7 }
 0x52d   :  { %v1175_v44 = vsub.f32 %v1170_v40, %v1173_v0 }
 0x52f   :  { %v1177_v46 = vadd.f32 1e-05, %v1175_v44 }
 0x531   :  { %2231 = vrsqrt.f32 %v1177_v46 }
 0x53b   :  { %v2232_v47 = vpop.eup %2231 }
 0x53c   :  { %v1180_v4 = vrot.slane %v2232_v47, 1 }
 0x53e   :  { %v1182_v55 = vmul.f32 %v1180_v4, %v1176_v2 }
 0x540   :  { %v1183_v56 = vmul.f32 %v1182_v55, %v1170_v40  ;;  %v1191_v18 = vrot.slane %v1182_v55, %v2640_v60 }
 0x542   :  { %v1185_v49 = vrot.slane %v1183_v56, 7 }
 0x544   :  { %v1187_v50 = vsub.f32 %v1176_v2, %v1185_v49 }
 0x546   :  { %v1195_v52 = vrot.slane %v1187_v50, %v2643_v61  ;;  %v2760_v25 = vpop.f32.mrb[16].mxu1 }
 0x547   :  { %v2762_v26 = vpop.f32.mrb[17].mxu1  ;;  %v1410_v5 = vmul.f32 %v2760_v25, %v2760_v25 }
 0x548   :  { %v1408_v1 = vmul.f32 %v2762_v26, %v2762_v26  ;;  %v2766_v31 = vpop.f32.mrb[18].mxu1  ;;  %v1196_v33 = vsel %vm515_vm3, %v1191_v18, %v1195_v52 }
 0x549   :  { %v2770_v3 = vpop.f32.mrb[19].mxu1  ;;  %2024 = vmatmul.mubr.msk.f32.vlgmr.msra.gmra.mrb[16].mxu0 %vm614_vm4, %v1196_v33  ;;  %v1411_v8 = vmul.f32 %v2766_v31, %v2766_v31 }
 0x54a   :  { %v1399_v6 = vadd.f32 %v2770_v3, %v2762_v26  ;;  %v1409_v7 = vmul.f32 %v2770_v3, %v2770_v3  ;;  %2136 = vmatpush3.bf16.msra.mxu0 %v2460_v28  ;;  %2078 = vmatprep.mubr.msk.f32.mxu0 %vm2337_vm0, %v2338_v42 }
 0x54b   :  { %2137 = vmatprep.subr.bf16.mxu0 %v2336_v29 }
 0x54c   :  { %v1400_v9 = vadd.f32 %v2760_v25, %v1399_v6  ;;  %v1412_v11 = vadd.f32 %v1409_v7, %v1408_v1 }
 0x54e   :  { %v1401_v12 = vadd.f32 %v2766_v31, %v1400_v9  ;;  %v1413_v13 = vadd.f32 %v1412_v11, %v1410_v5  ;;  %2139 = vmatpush3.bf16.msra.mxu0 %v2471_v32 }
 0x54f   :  { %2140 = vmatprep.subr.bf16.mxu0 %v2336_v29 }
 0x550   :  { %v1402_v14 = vrot.slane %v1401_v12, 4  ;;  %v1414_v28 = vadd.f32 %v1413_v13, %v1411_v8 }
 0x552   :  { %v1403_v15 = vadd.f32 %v1402_v14, %v1401_v12  ;;  %v1415_v16 = vrot.slane %v1414_v28, 4  ;;  %2142 = vmatpush3.bf16.msra.mxu0 %v2481_v35 }
 0x553   :  { %2143 = vmatprep.subr.bf16.mxu0 %v2336_v29 }
 0x554   :  { %v1404_v17 = vrot.slane %v1403_v15, 2  ;;  %v1416_v19 = vadd.f32 %v1415_v16, %v1414_v28 }
 0x556   :  { %v1405_v21 = vadd.f32 %v1404_v17, %v1403_v15  ;;  %v1417_v22 = vrot.slane %v1416_v19, 2  ;;  %2145 = vmatpush3.bf16.msra.mxu0 %v2491_v38 }
 0x557   :  { %2146 = vmatprep.subr.bf16.mxu0 %v2336_v29 }
 0x558   :  { %v1406_v23 = vrot.slane %v1405_v21, 1  ;;  %v1418_v32 = vadd.f32 %v1417_v22, %v1416_v19 }
 0x55a   :  { %2148 = vmatpush3.bf16.msra.mxu0 %v2500_v41  ;;  %v1419_v24 = vrot.slane %v1418_v32, 1  ;;  %v1407_v27 = vadd.f32 %v1406_v23, %v1405_v21 }
 0x55b   :  { %2149 = vmatprep.subr.bf16.mxu0 %v2336_v29 }
 0x55c   :  { %v1420_v30 = vadd.f32 %v1419_v24, %v1418_v32 }
 0x55e   :  { %2151 = vmatpush3.bf16.msra.mxu0 %v2512_v45  ;;  %v1421_v35 = vsel %vm515_vm3, %v1407_v27, %v1420_v30 }
 0x55f   :  { %2152 = vmatprep.subr.bf16.mxu0 %v2336_v29 }
 0x562   :  { %2154 = vmatpush3.bf16.msra.mxu0 %v2522_v48 }
 0x563   :  { %2155 = vmatprep.subr.bf16.mxu0 %v2336_v29 }
 0x566   :  { %2157 = vmatpush3.bf16.msra.mxu0 %v2532_v51  ;;  %v1498_v51 = vld [vmem:[%s2848_s10] sm:$0x3]  ;;  %s2339_s10 = smov [#allocation8]  }
 0x567   :  { %2081 = vmatprep.subr.mxu0 %v2338_v42  ;;  %s1625_s19 = sshll.u32 %s2339_s10, 4  ;;  %s1626_s19 = int_to_ptr.vmem [resolvable:$true] %s1625_s19 }
 0x568   :  { %s2301_s0 = scalar_lea.vmem %s1626_s19, 512  ;;  %p2306_p11 = scmp.lt.s32.totalorder %s1626_s19, %s1626_s19 }
 0x569   :  { %2079 = vmatmul.mubr.f32.vlgmr.msra.gmra.mrb[18].mxu0 %v1421_v35  ;;  %p2302_p10 = scmp.ne.s32.totalorder %s1626_s19, %s2301_s0  ;;  %p2307_p12 = scmp.lt.s32.totalorder %s2301_s0, %s2301_s0 }
 0x56a   :  { %2082 = vmatpush3.msra.mxu0 %v2633_v20  ;;  %2083 = vmatprep.mubr.msk.f32.mxu0 %vm2337_vm0, %v2338_v42 }
 0x56b   :  { %p2308_p13 = por %p2307_p12, %p2306_p11 }
 0x56d   :  { %p2309_p0 = pnand %p2308_p13, %p2302_p10 }
 0x61c   :  { %v1266_v38 = vpop.f32.mrb[16].mxu0 }
 0x61d   :  { %v2025_v41 = vpop.f32.mrb[17].mxu0  ;;  %v1273_v46 = vrot.slane %v1266_v38, %v2640_v60  ;;  %v1281_v18 = vrot.slane %v1266_v38, %v2643_v61 }
 0x61f   :  { %v1274_v47 = vmul.f32 %v1273_v46, %v2713_v58  ;;  %v1275_v2 = vmul.f32 %v1273_v46, %v2715_v63  ;;  %v1276_v4 = vmul.f32 %v1273_v46, %v2709_v54  ;;  %v1277_v55 = vmul.f32 %v1273_v46, %v2711_v57 }
 0x621   :  { %v1282_v33 = vadd.f32 %v1281_v18, %v1274_v47  ;;  %v1283_v54 = vadd.f32 %v1281_v18, %v1275_v2  ;;  %v1284_v5 = vadd.f32 %v1281_v18, %v1276_v4  ;;  %v1285_v57 = vadd.f32 %v1281_v18, %v1277_v55 }
 0x63c   :  { %v1488_v45 = vpop.f32.mrb[18].mxu0 }
 0x63d   :  { %v1492_v34 = vmul.f32 0.001953125, %v1488_v45  ;;  %v2080_v36 = vpop.f32.mrb[19].mxu0 }
 0x63f   :  { %v1493_v10 = vmul.f32 %v1492_v34, %v1492_v34 }
 0x641   :  { %v1495_v59 = vrot.slane %v1493_v10, 7 }
 0x643   :  { %v1497_v48 = vsub.f32 %v1492_v34, %v1495_v59 }
 0x645   :  { %v1499_v37 = vadd.f32 1e-05, %v1497_v48 }
 0x647   :  { %2233 = vrsqrt.f32 %v1499_v37 }
 0x651   :  { %v2234_v29 = vpop.eup %2233 }
 0x652   :  { %v1502_v39 = vrot.slane %v2234_v29, 1 }
 0x654   :  { %v1504_v20 = vmul.f32 %v1502_v39, %v1498_v51 }
 0x656   :  { %v1505_v40 = vmul.f32 %v1504_v20, %v1492_v34  ;;  %v1513_v43 = vrot.slane %v1504_v20, %v2640_v60 }
 0x658   :  { %v1507_v62 = vrot.slane %v1505_v40, 7 }
 0x65a   :  { %v1509_v42 = vsub.f32 %v1498_v51, %v1507_v62 }
 0x65c   :  { %v1517_v0 = vrot.slane %v1509_v42, %v2643_v61 }
 0x65e   :  { %v1518_v44 = vsel %vm515_vm3, %v1513_v43, %v1517_v0 }
 0x65f   :  { %2084 = vmatmul.mubr.msk.f32.vlgmr.msra.gmra.mrb[20].mxu0 %vm614_vm4, %v1518_v44 }
 0x732   :  { %v1588_v56 = vpop.f32.mrb[20].mxu0 }
 0x733   :  { %v1595_v49 = vrot.slane %v1588_v56, %v2640_v60  ;;  %v2085_v50 = vpop.f32.mrb[21].mxu0  ;;  %v1603_v53 = vrot.slane %v1588_v56, %v2643_v61 }
 0x735   :  { %v1596_v52 = vmul.f32 %v1595_v49, %v2762_v26  ;;  %v1597_v1 = vmul.f32 %v1595_v49, %v2770_v3  ;;  %v1598_v58 = vmul.f32 %v2760_v25, %v1595_v49  ;;  %v1599_v63 = vmul.f32 %v2766_v31, %v1595_v49 }
 0x737   :  { %v1604_v6 = vadd.f32 %v1603_v53, %v1596_v52  ;;  %v1605_v7 = vadd.f32 %v1603_v53, %v1597_v1  ;;  %v1606_v60 = vadd.f32 %v1603_v53, %v1598_v58  ;;  %v1607_v8 = vadd.f32 %v1603_v53, %v1599_v63 }
 0x739   :  { %v1608_v9 = vadd.f32 %v1604_v6, %v1282_v33  ;;  %v1609_v61 = vadd.f32 %v1605_v7, %v1283_v54  ;;  %v1610_v11 = vadd.f32 %v1606_v60, %v1284_v5  ;;  %v1611_v26 = vadd.f32 %v1607_v8, %v1285_v57 }
 0x73b   :  { %v1612_v3 = vmax.f32 %v1608_v9, 0.0  ;;  %v1613_v12 = vmax.f32 %v1609_v61, 0.0  ;;  %v1614_v25 = vmax.f32 %v1610_v11, 0.0  ;;  %v1615_v13 = vmax.f32 %v1611_v26, 0.0 }
 0x73d   :  { %1616 = vst [vmem:[#allocation8] sm:$0xff] %v1612_v3  ;;  %1617 = vst [vmem:[#allocation8 + $0x8] sm:$0xff] %v1613_v12 }
 0x73e   :  { %1618 = vst [vmem:[#allocation8 + $0x10] sm:$0xff] %v1614_v25  ;;  %1619 = vst [vmem:[#allocation8 + $0x18] sm:$0xff] %v1615_v13 }
 0x73f   :  { %2312 = shalt.err (!%p2309_p0)
}
 0x740   :  { %s2313_s27 = scalar_lea.hbm %s2849_s11, 512 }
 0x741   :  { %p2314_p1 = scmp.ne.s32.totalorder %s2849_s11, %s2313_s27  ;;  %p2317_p2 = scmp.lt.u32.totalorder %s2313_s27, %s2849_s11 }
 0x743   :  { %p2319_p3 = pnand %p2317_p2, %p2314_p1 }
 0x745   :  { %2322 = shalt.err (!%p2319_p3)
}
 0x746   :  { %s2340_s8 = smov 128   ;;  %s2341_s21 = smov 8  }
 0x747   :  { %1631 = dma.vmem_to_hbm [thread:$0]  %s1626_s19, 512, %s2849_s11, [#allocation4], %s2340_s8, %s2340_s8, %s2341_s21  }
 0x748   :  { %2327 = dma.done.wait [#allocation4], 512  }
 0x749   :  { %2328 = vsyncadd [#allocation4], 4294966784 }
 0x74a   :  { %1635 = vsyncpa [#allocation3], 1 }
 0x74b   :  { %1636 = vsyncpa [#allocation6], 1 }
 0x74c   :  { %1637 = vsyncpa [#allocation4], 1 }

</bundles_post_ra>
